<compile_context>
chip_gen: v7x
topology: tpu7x:2x2x1
jax: 0.10.0
libtpu: 0.0.40
codegen_flags: <defaults>
</compile_context>

<pallas_src>
import jax
import jax.numpy as jnp
import numpy as np
from jax.experimental import pallas as pl
from jax.experimental.pallas import tpu as pltpu

HIDDEN1 = 50      # fc1: embedding_dim -> 50
SEQ_LEN = 134     # fc3: 134 -> 1, so flatten(-2, -1) implies seq_len == 134


def fused_forward_kernel(e_ref, w_ref, c_ref, out_ref):
    """One grid step = one batch tile.

    e_ref:   (TB, S*D)  flattened gathered embeddings for this batch tile
    w_ref:   (1,  S*D)  fused weight row: w_fused[0, s*D + d] = w3[s] * (w1 @ w2)[d]
    c_ref:   (1, 1)     fused bias: (b1 @ w2 + b2) * sum(w3) + b3
    out_ref: (1, TB)    sigmoid(logits), batch on the lane axis (lane-dense store)
    """
    # (1, S*D) x (TB, S*D) contracted over S*D  ->  (1, TB).
    # K = S*D (4288 here) actually fills the MXU, unlike the old K=32/50 matmuls.
    z = jax.lax.dot_general(
        w_ref[...], e_ref[...],
        dimension_numbers=(((1,), (1,)), ((), ())),
        preferred_element_type=jnp.float32,
    ) + c_ref[...]

    # Numerically-stable sigmoid: exp routes to the EUP (idle slot), divide is exact.
    ez = jnp.exp(-jnp.abs(z))
    out_ref[...] = jnp.where(z >= 0.0, 1.0 / (1.0 + ez), ez / (1.0 + ez))


def _pick_batch_tile(batch, row_bytes, vmem_budget_bytes=24 << 20):
    """Largest lane-aligned batch tile whose double-buffered e-tile fits VMEM.

    Output blocks are (1, TB), so TB must be a multiple of 128 unless it covers
    the whole batch.  The budget is conservative for v7x (64 MiB physical /
    32 MiB default-scoped VMEM).
    """
    for tb in (512, 256, 128):
        if batch % tb == 0 and 2 * tb * row_bytes <= vmem_budget_bytes:
            return tb
    return batch   # small / odd batch: single tile covering the whole batch


def base_network_forward(input_ids, emb_table, w1, b1, w2, b2, w3, b3):
    B, S = input_ids.shape
    D = emb_table.shape[1]
    assert S == SEQ_LEN, "fc3 requires seq_len == 134"
    SD = S * D

    # ---- Algebraically fuse fc1 -> fc2 -> fc3 (no nonlinearity between them). ----
    v = w1 @ w2                                      # (D, 1)
    w_fused = (w3 * v.T).reshape(1, SD)              # (S, D) -> (1, S*D)
    const = (b1 @ w2 + b2) * jnp.sum(w3) + b3        # (1, 1)

    # Embedding lookup (gather) stays as plain-JAX glue.
    # TODO(synk): fuse the gather into the kernel (scalar-prefetched ids + row
    # gather from emb_table left in HBM) to avoid materializing (B, S, D) in HBM
    # and re-reading it; kept out-of-kernel here for lowering robustness.
    e_flat = jnp.take(emb_table, input_ids, axis=0).reshape(B, SD)   # (B, S*D)

    TB = _pick_batch_tile(B, SD * 4)
    grid = (B // TB,)

    out = pl.pallas_call(
        fused_forward_kernel,
        out_shape=jax.ShapeDtypeStruct((1, B), jnp.float32),
        grid=grid,
        in_specs=[
            pl.BlockSpec((TB, SD), lambda i: (i, 0)),    # embeddings: one batch tile
            pl.BlockSpec((1, SD), lambda i: (0, 0)),     # fused weight (replicated)
            pl.BlockSpec((1, 1), lambda i: (0, 0)),      # fused bias
        ],
        out_specs=pl.BlockSpec((1, TB), lambda i: (0, i)),   # lane-dense output tile
        compiler_params=pltpu.CompilerParams(
            dimension_semantics=("parallel",)),              # distinct out tiles -> megacore-safe
    )(e_flat, w_fused, const)

    return out.T            # (B, 1), matching the PyTorch module's output shape


def ref_forward(input_ids, emb_table, w1, b1, w2, b2, w3, b3):
    """Pure-JAX reference matching the PyTorch forward (unfused order)."""
    e = emb_table[input_ids]                 # (B, S, D)
    h1 = e @ w1 + b1[0]                      # (B, S, 50)
    h2 = h1 @ w2 + b2[0]                     # (B, S, 1)
    flat = h2[..., 0]                        # (B, S)
    logit = flat @ w3 + b3[0]                # (B, 1)
    return jax.nn.sigmoid(logit)


if __name__ == "__main__":
    # Small, deterministic synthetic setup (no checkpoint loading).
    VOCAB = 100
    EMB_DIM = 32
    BATCH = 2

    key = jax.random.PRNGKey(0)
    keys = jax.random.split(key, 8)

    emb_table = jax.random.normal(keys[0], (VOCAB, EMB_DIM), jnp.float32)
    w1 = 0.1 * jax.random.normal(keys[1], (EMB_DIM, HIDDEN1), jnp.float32)
    b1 = 0.1 * jax.random.normal(keys[2], (1, HIDDEN1), jnp.float32)
    w2 = 0.1 * jax.random.normal(keys[3], (HIDDEN1, 1), jnp.float32)
    b2 = 0.1 * jax.random.normal(keys[4], (1, 1), jnp.float32)
    w3 = 0.1 * jax.random.normal(keys[5], (SEQ_LEN, 1), jnp.float32)
    b3 = 0.1 * jax.random.normal(keys[6], (1, 1), jnp.float32)

    input_ids = jax.random.randint(keys[7], (BATCH, SEQ_LEN), 0, VOCAB,
                                   dtype=jnp.int32)

    out = base_network_forward(input_ids, emb_table, w1, b1, w2, b2, w3, b3)
    out = jax.block_until_ready(out)

    ref = ref_forward(input_ids, emb_table, w1, b1, w2, b2, w3, b3)
    np.testing.assert_allclose(np.asarray(out), np.asarray(ref),
                               rtol=1e-5, atol=1e-5)

    print("KERNEL_OK")
</pallas_src>

<mosaic_0001>
module attributes {stable_mosaic.version = 11 : i64} {
  func.func @fused_forward_kernel(%arg0: i32, %arg1: memref<2x4288xf32, #tpu.memory_space<vmem>>, %arg2: memref<1x4288xf32, #tpu.memory_space<vmem>>, %arg3: memref<1x1xf32, #tpu.memory_space<vmem>>, %arg4: memref<1x2xf32, #tpu.memory_space<vmem>>) attributes {dimension_semantics = [#tpu.dimension_semantics<parallel>], iteration_bounds = array<i64: 1>, scalar_prefetch = 0 : i64, scratch_operands = 0 : i64, tpu.core_type = #tpu.core_type<tc>, window_params = [{transform_indices = @transform_0, window_bounds = array<i64: 2, 4288>}, {pipeline_mode = #tpu.pipeline_mode<synchronous>, transform_indices = @transform_1, window_bounds = array<i64: 1, 4288>}, {pipeline_mode = #tpu.pipeline_mode<synchronous>, transform_indices = @transform_2, window_bounds = array<i64: 1, 1>}, {transform_indices = @transform_3, window_bounds = array<i64: 1, 2>}]} {
    %c0 = arith.constant 0 : index
    %c0_0 = arith.constant 0 : index
    %0 = vector.load %arg2[%c0, %c0_0] : memref<1x4288xf32, #tpu.memory_space<vmem>>, vector<1x4288xf32>
    %c0_1 = arith.constant 0 : index
    %c0_2 = arith.constant 0 : index
    %1 = vector.load %arg1[%c0_1, %c0_2] : memref<2x4288xf32, #tpu.memory_space<vmem>>, vector<2x4288xf32>
    %cst = arith.constant dense<0.000000e+00> : vector<1x2xf32>
    %2 = tpu.matmul %0, %1, %cst {dimension_numbers = #tpu.dot_dimension_numbers<[1], [1], [0], [0], [0, 0, 1, 0], [], []>} : vector<1x4288xf32>, vector<2x4288xf32>, vector<1x2xf32> -> vector<1x2xf32>
    %c0_3 = arith.constant 0 : index
    %c0_4 = arith.constant 0 : index
    %3 = vector.load %arg3[%c0_3, %c0_4] : memref<1x1xf32, #tpu.memory_space<vmem>>, vector<1x1xf32>
    %4 = vector.broadcast %3 : vector<1x1xf32> to vector<1x2xf32>
    %5 = arith.addf %2, %4 : vector<1x2xf32>
    %6 = math.absf %5 : vector<1x2xf32>
    %cst_5 = arith.constant 0.000000e+00 : f32
    %7 = vector.broadcast %cst_5 : f32 to vector<1x2xf32>
    %8 = arith.subf %7, %6 : vector<1x2xf32>
    %9 = math.exp %8 : vector<1x2xf32>
    %cst_6 = arith.constant 0.000000e+00 : f32
    %10 = vector.broadcast %cst_6 : f32 to vector<1x2xf32>
    %11 = arith.cmpf oge, %5, %10 : vector<1x2xf32>
    %cst_7 = arith.constant 1.000000e+00 : f32
    %12 = vector.broadcast %cst_7 : f32 to vector<1x2xf32>
    %13 = arith.addf %12, %9 : vector<1x2xf32>
    %cst_8 = arith.constant 1.000000e+00 : f32
    %14 = vector.broadcast %cst_8 : f32 to vector<1x2xf32>
    %15 = arith.divf %14, %13 : vector<1x2xf32>
    %cst_9 = arith.constant 1.000000e+00 : f32
    %16 = vector.broadcast %cst_9 : f32 to vector<1x2xf32>
    %17 = arith.addf %16, %9 : vector<1x2xf32>
    %18 = arith.divf %9, %17 : vector<1x2xf32>
    %19 = arith.select %11, %15, %18 : vector<1x2xi1>, vector<1x2xf32>
    %c0_10 = arith.constant 0 : index
    %c0_11 = arith.constant 0 : index
    %20 = vector.load %arg4[%c0_10, %c0_11] : memref<1x2xf32, #tpu.memory_space<vmem>>, vector<1x2xf32>
    tpu.vector_store %arg4[%c0_10, %c0_11], %19 {strides = array<i32>} : memref<1x2xf32, #tpu.memory_space<vmem>>, vector<1x2xf32>,
    return
  }
  func.func @transform_0(%arg0: i32) -> (i32, i32) {
    %c0_i32 = arith.constant 0 : i32
    %c0_i32_0 = arith.constant 0 : i32
    return %arg0, %c0_i32 : i32, i32
  }
  func.func @transform_1(%arg0: i32) -> (i32, i32) {
    %c0_i32 = arith.constant 0 : i32
    %c0_i32_0 = arith.constant 0 : i32
    %c0_i32_1 = arith.constant 0 : i32
    return %c0_i32, %c0_i32_0 : i32, i32
  }
  func.func @transform_2(%arg0: i32) -> (i32, i32) {
    %c0_i32 = arith.constant 0 : i32
    %c0_i32_0 = arith.constant 0 : i32
    %c0_i32_1 = arith.constant 0 : i32
    return %c0_i32, %c0_i32_0 : i32, i32
  }
  func.func @transform_3(%arg0: i32) -> (i32, i32) {
    %c0_i32 = arith.constant 0 : i32
    %c0_i32_0 = arith.constant 0 : i32
    return %c0_i32, %arg0 : i32, i32
  }
}

</mosaic_0001>

<bundles_post_ra>
// kernel: tpu_custom_call.1
= control target key start
LH: loop header
LB: loop body
LE: loop exit
PB: predicated region body
PF: predicated region fallthrough
CT: control target
= control target key end

     0   :  { %s1957_s0 = inlined_call_operand.hbm [shape: f32[2,4288], index: 0, kind: input, shape index: {}]   ;;  %s1958_s1 = inlined_call_operand.hbm [shape: f32[1,4288], index: 1, kind: input, shape index: {}]   ;;  %s1959_s2 = inlined_call_operand.<no memory space> [shape: f32[1,1], index: 2, kind: input, shape index: {}]   ;;  %s1960_s3 = inlined_call_operand.hbm [shape: f32[1,2], index: 3, kind: output, shape index: {}]  }
   0x1   :  { %v8_v0 = vstv %s1959_s2 }
   0x2   :  { %9 = vst [vmem:[#allocation2] sm:$0x1] %v8_v0 }
   0x3   :  { %10 = vsyncpa [#allocation4], 0 }
   0x4   :  { %11 = vsyncpa [#allocation7], 0 }
   0x5   :  { %12 = vsyncpa [#allocation5], 0  ;;  %s1773_s14 = smov [#allocation3]   ;;  %s1774_s16 = smov [#allocation6]  }
   0x6   :  { %s19_s15 = sshll.u32 %s1773_s14, 4  ;;  %s29_s17 = sshll.u32 %s1774_s16, 4  ;;  %s20_s15 = int_to_ptr.vmem [resolvable:$true] %s19_s15  ;;  %s30_s17 = int_to_ptr.vmem [resolvable:$true] %s29_s17 }
   0x7   :  { %s1701_s20 = scalar_lea.hbm %s1957_s0, 1088 }
   0x8   :  { %p1702_p0 = scmp.ne.s32.totalorder %s1957_s0, %s1701_s20  ;;  %p1705_p1 = scmp.lt.u32.totalorder %s1701_s20, %s1957_s0 }
   0xa   :  { %p1707_p2 = pnand %p1705_p1, %p1702_p0 }
   0xc   :  { %1710 = shalt.err (!%p1707_p2)
}
   0xd   :  { %s1711_s24 = scalar_lea.vmem %s20_s15, 1088  ;;  %p1716_p4 = scmp.lt.s32.totalorder %s20_s15, %s20_s15 }
   0xe   :  { %p1712_p3 = scmp.ne.s32.totalorder %s20_s15, %s1711_s24  ;;  %p1717_p5 = scmp.lt.s32.totalorder %s1711_s24, %s1711_s24 }
  0x10   :  { %p1718_p6 = por %p1717_p5, %p1716_p4 }
  0x12   :  { %p1719_p7 = pnand %p1718_p6, %p1712_p3 }
  0x14   :  { %1722 = shalt.err (!%p1719_p7)
}
  0x15   :  { %22 = dma.hbm_to_vmem [thread:$0]  %s1957_s0, 1088, %s20_s15, [#allocation4]  }
  0x16   :  { %s1723_s29 = scalar_lea.hbm %s1958_s1, 544 }
  0x17   :  { %p1724_p8 = scmp.ne.s32.totalorder %s1958_s1, %s1723_s29  ;;  %p1727_p9 = scmp.lt.u32.totalorder %s1723_s29, %s1958_s1 }
  0x19   :  { %p1729_p10 = pnand %p1727_p9, %p1724_p8 }
  0x1b   :  { %1732 = shalt.err (!%p1729_p10)
}
  0x1c   :  { %s1733_s7 = scalar_lea.vmem %s30_s17, 544  ;;  %p1738_p12 = scmp.lt.s32.totalorder %s30_s17, %s30_s17 }
  0x1d   :  { %p1734_p11 = scmp.ne.s32.totalorder %s30_s17, %s1733_s7  ;;  %p1739_p13 = scmp.lt.s32.totalorder %s1733_s7, %s1733_s7 }
  0x1f   :  { %p1740_p0 = por %p1739_p13, %p1738_p12 }
  0x21   :  { %p1741_p1 = pnand %p1740_p0, %p1734_p11 }
  0x23   :  { %1744 = shalt.err (!%p1741_p1)
}
  0x24   :  { %32 = dma.hbm_to_vmem [thread:$0]  %s1958_s1, 544, %s30_s17, [#allocation7]  }
  0x25   :  { %1767 = dma.done.wait [#allocation4], 1088  }
  0x26   :  { %1768 = vsyncadd [#allocation4], 4294966208 }
  0x27   :  { %1769 = dma.done.wait [#allocation7], 544  }
  0x28   :  { %1770 = vsyncadd [#allocation7], 4294966752  ;;  %v61_v1 = vlaneseq  ;;  %v1775_v2 = vmov 1983009808   ;;  %v1776_v4 = vmov 0   ;;  %v46_v9 = vld [vmem:[#allocation3] sm:$0xff] }
  0x29   :  { %v250_v3 = vunpack.c.l.s4 %v1775_v2  ;;  %1688 = vset.pattern.permute.xlu0 %v1776_v4  ;;  %v50_v10 = vld [vmem:[#allocation3 + $0x20] sm:$0xff]  ;;  %v248_v13 = vcombine.high %v46_v9, %v46_v9  ;;  %v1840_v17 = vld [vmem:[#allocation6 + $0x10] sm:$0xff]  ;;  %v51_v25 = vld [vmem:[#allocation3 + $0x28] sm:$0xff]  ;;  %vm425_vm0 = vcmask 523264   ;;  %s1777_s1 = smov [#allocation8]   ;;  %vm1630_vm1 = vcmask 8192  }
  0x2a   :  { %v1825_v5 = vshrl.u32 %v61_v1, 7  ;;  %v1833_v11 = vld [vmem:[#allocation6] sm:$0xff]  ;;  %v316_v15 = vcombine.high %v50_v10, %v50_v10  ;;  %v55_v31 = vld [vmem:[#allocation2] sm:$0x1]  ;;  %v333_v38 = vcombine.high %v51_v25, %v51_v25  ;;  %v52_v51 = vld [vmem:[#allocation3 + $0x30] sm:$0xff]  ;;  %s1638_s9 = sshll.u32 %s1777_s1, 4  ;;  %s1639_s9 = int_to_ptr.vmem [resolvable:$true] %s1638_s9 }
  0x2b   :  { %v251_v6 = vunpack.c.0.s8 %v250_v3  ;;  %v47_v26 = vld [vmem:[#allocation3 + $0x8] sm:$0xff]  ;;  %58 = vperm.xlu0 %1688, %v55_v31   ;;  %v48_v52 = vld [vmem:[#allocation3 + $0x10] sm:$0xff]  ;;  %v350_v62 = vcombine.high %v52_v51, %v52_v51  ;;  %v1898_v2 = vld [vmem:[#allocation6 + $0x18] sm:$0xff]  ;;  %s1745_s10 = scalar_lea.vmem %s1639_s9, 16  ;;  %s1749_s11 = scalar_lea.vmem %s1639_s9, 32 }
  0x2c   :  { %v1831_v8 = vsub.s32 1, %v1825_v5  ;;  %v1836_v12 = vsub.s32 0, %v1825_v5  ;;  %v1847_v20 = vsub.s32 3, %v1825_v5  ;;  %v265_v39 = vcombine.high %v47_v26, %v47_v26  ;;  %v1896_v1 = vld [vmem:[#allocation6 + $0x8] sm:$0xff]  ;;  %p1746_p2 = scmp.ne.s32.totalorder %s1639_s9, %s1745_s10  ;;  %p1750_p3 = scmp.lt.s32.totalorder %s1639_s9, %s1639_s9 }
  0x2d   :  { %v1828_v7 = vsub.s32 %v251_v6, %v1825_v5  ;;  %v1862_v40 = vsub.s32 2, %v1825_v5  ;;  %v1865_v41 = vsub.s32 5, %v1825_v5  ;;  %v1878_v50 = vsub.s32 4, %v1825_v5  ;;  %p1751_p4 = scmp.lt.s32.totalorder %s1749_s11, %s1745_s10 }
  0x2e   :  { %v77_v18 = vrot.slane %v1833_v11, %v1831_v8  ;;  %v141_v19 = vrot.slane %v1840_v17, %v1831_v8  ;;  %v73_v27 = vrot.slane %v1833_v11, %v1836_v12  ;;  %v137_v28 = vrot.slane %v1840_v17, %v1836_v12 }
  0x2f   :  { %v255_v14 = vrot.slane %v46_v9, %v1828_v7  ;;  %v323_v16 = vrot.slane %v50_v10, %v1828_v7  ;;  %v330_v23 = vrot.slane %v316_v15, %v1828_v7  ;;  %v262_v24 = vrot.slane %v248_v13, %v1828_v7  ;;  %v53_v15 = vld [vmem:[#allocation3 + $0x38] sm:$0xff]  ;;  %p1752_p5 = por %p1751_p4, %p1750_p3 }
  0x30   :  { %494 = vmatprep.mubr.f32.mxu1 %v77_v18  ;;  %1054 = vmatprep.mubr.f32.mxu0 %v141_v19  ;;  %v340_v32 = vrot.slane %v51_v25, %v1828_v7  ;;  %v272_v33 = vrot.slane %v47_v26, %v1828_v7  ;;  %v85_v34 = vrot.slane %v1833_v11, %v1847_v20  ;;  %v1881_v53 = vsub.s32 7, %v1825_v5 }
  0x31   :  { %v263_v21 = vcombine.high %v255_v14, %v255_v14  ;;  %v331_v22 = vcombine.high %v323_v16, %v323_v16  ;;  %v332_v29 = vcombine.high %v330_v23, %v330_v23  ;;  %v264_v30 = vcombine.high %v262_v24, %v262_v24  ;;  %p1753_p6 = pnand %p1752_p5, %p1746_p2 }
  0x32   :  { %v149_v35 = vrot.slane %v1840_v17, %v1847_v20  ;;  %v348_v36 = vcombine.high %v340_v32, %v340_v32  ;;  %v280_v37 = vcombine.high %v272_v33, %v272_v33  ;;  %v347_v42 = vrot.slane %v333_v38, %v1828_v7 }
  0x33   :  { %430 = vmatprep.subr.mxu1 %v263_v21  ;;  %990 = vmatprep.subr.mxu0 %v331_v22  ;;  %v279_v43 = vrot.slane %v265_v39, %v1828_v7  ;;  %v81_v44 = vrot.slane %v1833_v11, %v1862_v40  ;;  %v145_v45 = vrot.slane %v1840_v17, %v1862_v40  ;;  %v1894_v0 = vsub.s32 6, %v1825_v5  ;;  %v45_v39 = vld [vmem:[#allocation6 + $0x20] sm:$0x3] }
  0x34   :  { %431 = vmatpush1.xpose.msra.mxu1 %v255_v14  ;;  %991 = vmatpush1.xpose.msra.mxu0 %v323_v16  ;;  %v93_v46 = vrot.slane %v1833_v11, %v1865_v41  ;;  %v157_v47 = vrot.slane %v1840_v17, %v1865_v41  ;;  %v349_v48 = vcombine.high %v347_v42, %v347_v42  ;;  %v49_v16 = vld [vmem:[#allocation3 + $0x18] sm:$0xff] }
  0x35   :  { %1060 = vmatprep.subr.mxu0 %v332_v29  ;;  %500 = vmatprep.subr.mxu1 %v264_v30  ;;  %v281_v49 = vcombine.high %v279_v43, %v279_v43  ;;  %v357_v54 = vrot.slane %v52_v51, %v1828_v7  ;;  %v289_v55 = vrot.slane %v48_v52, %v1828_v7 }
  0x36   :  { %v89_v56 = vrot.slane %v1833_v11, %v1878_v50  ;;  %v153_v57 = vrot.slane %v1840_v17, %v1878_v50  ;;  %v101_v58 = vrot.slane %v1833_v11, %v1881_v53  ;;  %v165_v59 = vrot.slane %v1840_v17, %v1881_v53 }
  0x37   :  { %495 = vmatmul.mubr.f32.vlgmr.msra.gmra.mrb[0].mxu1 %v73_v27  ;;  %1055 = vmatmul.mubr.f32.vlgmr.msra.gmra.mrb[0].mxu0 %v137_v28  ;;  %v365_v60 = vcombine.high %v357_v54, %v357_v54  ;;  %v297_v61 = vcombine.high %v289_v55, %v289_v55  ;;  %v282_v63 = vcombine.high %v48_v52, %v48_v52 }
  0x38   :  { %1061 = vmatpush1.xpose.msra.mxu0 %v330_v23  ;;  %501 = vmatpush1.xpose.msra.mxu1 %v262_v24  ;;  %v364_v3 = vrot.slane %v350_v62, %v1828_v7  ;;  %v97_v6 = vrot.slane %v1833_v11, %v1894_v0  ;;  %v161_v5 = vrot.slane %v1840_v17, %v1894_v0 }
  0x39   :  { %564 = vmatprep.mubr.f32.mxu1 %v85_v34  ;;  %1124 = vmatprep.mubr.f32.mxu0 %v149_v35  ;;  %v296_v4 = vrot.slane %v282_v63, %v1828_v7  ;;  %v109_v9 = vrot.slane %v1896_v1, %v1831_v8  ;;  %v173_v10 = vrot.slane %v1898_v2, %v1831_v8  ;;  %v1648_v35 = vld.sshfl [vmem:[#allocation3 + $0x40] sm:$0x33 pattern:$0x76325410] }
  0x3a   :  { %1130 = vmatprep.subr.mxu0 %v348_v36  ;;  %570 = vmatprep.subr.mxu1 %v280_v37  ;;  %v366_v13 = vcombine.high %v364_v3, %v364_v3  ;;  %v374_v11 = vrot.slane %v53_v15, %v1828_v7  ;;  %v306_v17 = vrot.slane %v49_v16, %v1828_v7 }
  0x3b   :  { %v298_v14 = vcombine.high %v296_v4, %v296_v4  ;;  %v105_v18 = vrot.slane %v1896_v1, %v1836_v12  ;;  %v169_v19 = vrot.slane %v1898_v2, %v1836_v12  ;;  %v117_v21 = vrot.slane %v1896_v1, %v1847_v20 }
  0x3c   :  { %v181_v22 = vrot.slane %v1898_v2, %v1847_v20  ;;  %v382_v23 = vcombine.high %v374_v11, %v374_v11  ;;  %v314_v24 = vcombine.high %v306_v17, %v306_v17  ;;  %v367_v25 = vcombine.high %v53_v15, %v53_v15 }
  0x3d   :  { %v299_v26 = vcombine.high %v49_v16, %v49_v16  ;;  %v113_v29 = vrot.slane %v1896_v1, %v1862_v40  ;;  %v177_v20 = vrot.slane %v1898_v2, %v1862_v40  ;;  %v125_v30 = vrot.slane %v1896_v1, %v1865_v41 }
  0x3e   :  { %v381_v27 = vrot.slane %v367_v25, %v1828_v7  ;;  %v189_v31 = vrot.slane %v1898_v2, %v1865_v41  ;;  %v185_v34 = vrot.slane %v1898_v2, %v1878_v50  ;;  %v133_v36 = vrot.slane %v1896_v1, %v1881_v53 }
  0x3f   :  { %565 = vmatmul.mubr.f32.vlgmr.msra.gmra.mrb[0].mxu1 %v81_v44  ;;  %1125 = vmatmul.mubr.f32.vlgmr.msra.gmra.mrb[0].mxu0 %v145_v45  ;;  %v313_v28 = vrot.slane %v299_v26, %v1828_v7  ;;  %v121_v7 = vrot.slane %v1896_v1, %v1878_v50  ;;  %v197_v37 = vrot.slane %v1898_v2, %v1881_v53 }
  0x40   :  { %1131 = vmatpush1.xpose.msra.mxu0 %v340_v32  ;;  %571 = vmatpush1.xpose.msra.mxu1 %v272_v33  ;;  %v383_v32 = vcombine.high %v381_v27, %v381_v27  ;;  %v391_v38 = vcombine.high %v1648_v35, %v1648_v35  ;;  %v129_v40 = vrot.slane %v1896_v1, %v1894_v0 }
  0x41   :  { %634 = vmatprep.mubr.f32.mxu1 %v93_v46  ;;  %1194 = vmatprep.mubr.f32.mxu0 %v157_v47  ;;  %v315_v33 = vcombine.high %v313_v28, %v313_v28  ;;  %v193_v41 = vrot.slane %v1898_v2, %v1894_v0 }
  0x42   :  { %1200 = vmatprep.subr.mxu0 %v349_v48  ;;  %640 = vmatprep.subr.mxu1 %v281_v49 }
  0x47   :  { %635 = vmatmul.mubr.f32.vlgmr.msra.gmra.mrb[0].mxu1 %v89_v56  ;;  %1195 = vmatmul.mubr.f32.vlgmr.msra.gmra.mrb[0].mxu0 %v153_v57 }
  0x48   :  { %1201 = vmatpush1.xpose.msra.mxu0 %v347_v42  ;;  %641 = vmatpush1.xpose.msra.mxu1 %v279_v43  ;;  %v205_v42 = vrot.slane %v45_v39, %v1831_v8  ;;  %v201_v43 = vrot.slane %v45_v39, %v1836_v12 }
  0x49   :  { %704 = vmatprep.mubr.f32.mxu1 %v101_v58  ;;  %1264 = vmatprep.mubr.f32.mxu0 %v165_v59 }
  0x4a   :  { %1270 = vmatprep.subr.mxu0 %v365_v60  ;;  %710 = vmatprep.subr.mxu1 %v297_v61 }
  0x4f   :  { %705 = vmatmul.mubr.f32.vlgmr.msra.gmra.mrb[0].mxu1 %v97_v6  ;;  %1265 = vmatmul.mubr.f32.vlgmr.msra.gmra.mrb[0].mxu0 %v161_v5 }
  0x50   :  { %1271 = vmatpush1.xpose.msra.mxu0 %v357_v54  ;;  %711 = vmatpush1.xpose.msra.mxu1 %v289_v55 }
  0x51   :  { %774 = vmatprep.mubr.f32.mxu1 %v109_v9  ;;  %1334 = vmatprep.mubr.f32.mxu0 %v173_v10 }
  0x52   :  { %1340 = vmatprep.subr.mxu0 %v366_v13  ;;  %780 = vmatprep.subr.mxu1 %v298_v14 }
  0x57   :  { %775 = vmatmul.mubr.f32.vlgmr.msra.gmra.mrb[0].mxu1 %v105_v18  ;;  %1335 = vmatmul.mubr.f32.vlgmr.msra.gmra.mrb[0].mxu0 %v169_v19 }
  0x58   :  { %1341 = vmatpush1.xpose.msra.mxu0 %v364_v3  ;;  %781 = vmatpush1.xpose.msra.mxu1 %v296_v4 }
  0x59   :  { %844 = vmatprep.mubr.f32.mxu1 %v117_v21  ;;  %1404 = vmatprep.mubr.f32.mxu0 %v181_v22 }
  0x5a   :  { %1410 = vmatprep.subr.mxu0 %v382_v23  ;;  %850 = vmatprep.subr.mxu1 %v314_v24 }
  0x5f   :  { %845 = vmatmul.mubr.f32.vlgmr.msra.gmra.mrb[0].mxu1 %v113_v29  ;;  %1405 = vmatmul.mubr.f32.vlgmr.msra.gmra.mrb[0].mxu0 %v177_v20 }
  0x60   :  { %1411 = vmatpush1.xpose.msra.mxu0 %v374_v11  ;;  %851 = vmatpush1.xpose.msra.mxu1 %v306_v17 }
  0x61   :  { %914 = vmatprep.mubr.f32.mxu1 %v125_v30  ;;  %1474 = vmatprep.mubr.f32.mxu0 %v189_v31 }
  0x62   :  { %1480 = vmatprep.subr.mxu0 %v383_v32  ;;  %920 = vmatprep.subr.mxu1 %v315_v33 }
  0x67   :  { %915 = vmatmul.mubr.f32.vlgmr.msra.gmra.mrb[0].mxu1 %v121_v7  ;;  %1475 = vmatmul.mubr.f32.vlgmr.msra.gmra.mrb[0].mxu0 %v185_v34 }
  0x68   :  { %1481 = vmatpush1.xpose.msra.mxu0 %v381_v27  ;;  %921 = vmatpush1.xpose.msra.mxu1 %v313_v28 }
  0x69   :  { %984 = vmatprep.mubr.f32.mxu1 %v133_v36  ;;  %1544 = vmatprep.mubr.f32.mxu0 %v197_v37 }
  0x6a   :  { %1649 = vmatprep.subr.msk.mxu0 %vm425_vm0, %v391_v38 }
  0x6f   :  { %985 = vmatmul.mubr.f32.vlgmr.msra.gmra.mrb[0].mxu1 %v129_v40  ;;  %1545 = vmatmul.mubr.f32.vlgmr.msra.gmra.mrb[0].mxu0 %v193_v41 }
  0x70   :  { %1551 = vmatpush1.xpose.msra.mxu0 %v1648_v35  ;;  %1650 = vmatprep.mubr.msk.f32.mxu0 %vm425_vm0, %v205_v42 }
  0x77   :  { %1615 = vmatmul.mubr.f32.vlgmr.msra.gmra.mrb[0].mxu0 %v201_v43 }
  0xaa   :  { %v59_v44 = vpop.permute.xlu0 %58 }
  0xab   :  { %v64_v47 = vrot.slane %v59_v44, %v1836_v12 }
 0x142   :  { %v986_v45 = vpop.f32.mrb[0].mxu1 }
 0x143   :  { %v988_v46 = vpop.f32.mrb[1].mxu1  ;;  %v1651_v48 = vadd.f32 %v986_v45, %v64_v47 }
 0x14a   :  { %v1616_v49 = vpop.f32.mrb[0].mxu0 }
 0x14b   :  { %v1652_v50 = vadd.f32 %v1651_v48, %v1616_v49  ;;  %v1618_v51 = vpop.f32.mrb[1].mxu0 }
 0x14d   :  { %v1620_v52 = vand.u32 2147483647, %v1652_v50  ;;  %vm1624_vm2 = vcmp.ge.f32.partialorder %v1652_v50, 0.0 }
 0x14f   :  { %v1621_v53 = vsub.f32 0.0, %v1620_v52 }
 0x151   :  { %v1622_v54 = vmul.f32 1.442695, %v1621_v53 }
 0x153   :  { %1697 = vpow2.f32 %v1622_v54 }
 0x15d   :  { %v1698_v8 = vpop.eup %1697 }
 0x15e   :  { %v1625_v55 = vadd.f32 1.0, %v1698_v8 }
 0x160   :  { %1699 = vrcp.f32 %v1625_v55 }
 0x16a   :  { %v1700_v56 = vpop.eup %1699 }
 0x16b   :  { %v1628_v57 = vmul.f32 %v1700_v56, %v1698_v8 }
 0x16d   :  { %v1629_v58 = vsel %vm1624_vm2, %v1700_v56, %v1628_v57 }
 0x16e   :  { %1631 = vst.msk [vmem:[#allocation8] sm:$0x1] %vm1630_vm1, %v1629_v58 }
 0x16f   :  { %1756 = shalt.err (!%p1753_p6)
}
 0x170   :  { %s1757_s14 = scalar_lea.hbm %s1960_s3, 16 }
 0x171   :  { %p1758_p7 = scmp.ne.s32.totalorder %s1960_s3, %s1757_s14  ;;  %p1761_p8 = scmp.lt.u32.totalorder %s1757_s14, %s1960_s3 }
 0x173   :  { %p1763_p9 = pnand %p1761_p8, %p1758_p7 }
 0x175   :  { %1766 = shalt.err (!%p1763_p9)
}
 0x176   :  { %1641 = dma.vmem_to_hbm [thread:$0]  %s1639_s9, 16, %s1960_s3, [#allocation5]  }
 0x177   :  { %1771 = dma.done.wait [#allocation5], 16  }
 0x178   :  { %1772 = vsyncadd [#allocation5], 4294967280 }
 0x179   :  { %1645 = vsyncpa [#allocation4], 1 }
 0x17a   :  { %1646 = vsyncpa [#allocation7], 1 }
 0x17b   :  { %1647 = vsyncpa [#allocation5], 1 }

</bundles_post_ra>
